<compile_context>
chip_gen: v5e
topology: v5e:2x2
jax: 0.10.0
libtpu: 0.0.40
codegen_flags: <defaults>
</compile_context>

<pallas_src>
import functools

import jax
import jax.numpy as jnp
from jax.experimental import pallas as pl
from jax.experimental.pallas import tpu as pltpu


def _round_up(x, m):
    return (x + m - 1) // m * m


def _cdiv(a, b):
    return (a + b - 1) // b


def _vmem_budget_bytes():
    """Physical VMEM per TensorCore minus headroom for Mosaic internal scratch."""
    cap = 64 * 1024 * 1024                      # conservative fallback (v7x per-TC)
    try:
        cap = int(pltpu.get_tpu_info().vmem_capacity_bytes)
    except Exception:
        pass
    return max(cap - 16 * 1024 * 1024, 32 * 1024 * 1024)


# ----------------------------------------------------------------------------
# Kernels
# ----------------------------------------------------------------------------
def _glu_mlp_resident_kernel(x_ref, w1a_ref, b1a_ref, w1b_ref, b1b_ref,
                             w2_ref, b2_ref, o_ref):
    """Path A: weights VMEM-resident (constant index_map), grid=(token_tiles,)."""
    x = x_ref[...]
    h_a = jnp.dot(x, w1a_ref[...], preferred_element_type=jnp.float32) + b1a_ref[...]
    h_b = jnp.dot(x, w1b_ref[...], preferred_element_type=jnp.float32) + b1b_ref[...]
    g = (h_a * jax.nn.sigmoid(h_b)).astype(w2_ref.dtype)
    y = jnp.dot(g, w2_ref[...], preferred_element_type=jnp.float32) + b2_ref[...]
    o_ref[...] = y.astype(o_ref.dtype)


def _glu_mlp_tiled_kernel(x_ref, w1a_ref, b1a_ref, w1b_ref, b1b_ref,
                          w2_ref, b2_ref, o_ref, acc_ref):
    """Path B: grid=(token_tiles, hidden_tiles); fc2 partials accumulate in f32."""
    k = pl.program_id(1)
    x = x_ref[...]
    h_a = jnp.dot(x, w1a_ref[...], preferred_element_type=jnp.float32) + b1a_ref[...]
    h_b = jnp.dot(x, w1b_ref[...], preferred_element_type=jnp.float32) + b1b_ref[...]
    g = (h_a * jax.nn.sigmoid(h_b)).astype(w2_ref.dtype)
    part = jnp.dot(g, w2_ref[...], preferred_element_type=jnp.float32)

    @pl.when(k == 0)
    def _():
        acc_ref[...] = part                     # direct assign: no zero-fill pass

    @pl.when(k > 0)
    def _():
        acc_ref[...] += part

    @pl.when(k == pl.num_programs(1) - 1)
    def _():
        o_ref[...] = (acc_ref[...] + b2_ref[...]).astype(o_ref.dtype)


# ----------------------------------------------------------------------------
# Wrapper
# ----------------------------------------------------------------------------
@functools.partial(jax.jit,
                   static_argnames=("tm", "compute_dtype", "force_hidden_tiles"))
def glu_mlp(x, w1, b1, w2, b2, *, tm=None, compute_dtype=None,
            force_hidden_tiles=False):
    """GluMlp forward.

    x : (..., in_features)
    w1: (in_features, hidden_features)      (pre-transposed nn.Linear weight)
    b1: (hidden_features,)
    w2: (hidden_features // 2, out_features)
    b2: (out_features,)
    compute_dtype: optional MXU input dtype (e.g. jnp.bfloat16).  Accumulation,
        gating and biases stay f32; output keeps x.dtype.
    """
    orig_shape = x.shape
    in_f = int(orig_shape[-1])
    hidden = int(w1.shape[1])
    assert hidden % 2 == 0, "hidden_features must be even for GLU"
    half = hidden // 2
    out_f = int(w2.shape[1])

    out_dtype = x.dtype
    cdtype = jnp.dtype(compute_dtype) if compute_dtype is not None else jnp.dtype(x.dtype)
    elt_c = cdtype.itemsize
    elt_o = jnp.dtype(out_dtype).itemsize

    x2d = x.reshape(-1, in_f).astype(cdtype)
    w1c = w1.astype(cdtype)
    w2c = w2.astype(cdtype)
    n_tok = int(x2d.shape[0])

    # --- token tiling ---------------------------------------------------------
    sub = max(8, 32 // elt_c)                   # f32: 8, bf16: 16, int8/fp8: 32
    n_tok_r = _round_up(max(n_tok, 1), sub)
    tm_user = _round_up(min(int(tm), n_tok_r), sub) if tm is not None else n_tok_r
    # v7x has two TensorCores and only the "parallel" token axis is sharded
    # across them -> guarantee >= 2 token tiles whenever the data allows.
    two_tile_cap = max(sub, _round_up(_cdiv(n_tok, 2), sub))
    tm_cap = max(sub, min(tm_user, two_tile_cap))

    # --- lane-dense output (unmasked vst) --------------------------------------
    out_p = _round_up(out_f, 128)

    budget = _vmem_budget_bytes()

    # --- VMEM estimators (double-buffered ins/outs + f32 temporaries) ----------
    def est_resident(tm_):
        wb = 2 * ((2 * in_f * half + half * out_p) * elt_c + (hidden + out_p) * 4)
        ab = 2 * (tm_ * in_f * elt_c + tm_ * out_p * elt_o)
        ib = (3 * tm_ * half + tm_ * out_p) * 4           # h_a, h_b, g, fc2 result
        return wb + ab + ib

    def est_tiled(tm_, th_):
        wb = 2 * ((2 * in_f * th_ + th_ * out_p) * elt_c + (2 * th_ + out_p) * 4)
        ab = 2 * (tm_ * in_f * elt_c + tm_ * out_p * elt_o)
        ib = (3 * tm_ * th_ + 2 * tm_ * out_p) * 4        # h_a/h_b/g + part + acc
        return wb + ab + ib

    # --- path selection ---------------------------------------------------------
    use_resident = not force_hidden_tiles
    th = half
    half_p = half
    n_k = 1
    tm_eff = sub

    if use_resident:
        tm_eff = min(_round_up(256, sub), tm_cap) if tm is None else tm_cap
        while est_resident(tm_eff) > budget and tm_eff > sub:
            tm_eff = max(sub, _round_up(tm_eff // 2, sub))
        if est_resident(tm_eff) > budget:
            use_resident = False

    if not use_resident:
        max_th = max(128, _round_up(half, 128))
        th_cands = [c for c in (512, 256, 128) if c <= max_th] or [128]
        tm_cands = []
        for c in (1024, 768, 512, 384, 256, 128, 64, 32, 16, 8):
            c = max(sub, min(_round_up(c, sub), tm_cap))
            if c not in tm_cands:
                tm_cands.append(c)
        chosen = None
        for tmc in tm_cands:            # big token tiles first: fewer weight re-streams
            for thc in th_cands:        # 512/256-wide hidden tiles fill the 2x256 MXU
                if est_tiled(tmc, thc) <= budget:
                    chosen = (tmc, thc)
                    break
            if chosen is not None:
                break
        if chosen is None:
            # TODO(synk): also tile the in_features (fc1-K) axis for very large
            # in_features on v7x's 64 MiB VMEM; fall back to the smallest config.
            chosen = (tm_cands[-1], th_cands[-1])
        tm_eff, th = chosen
        half_p = _round_up(half, th)
        n_k = half_p // th

    n_pad = _round_up(max(n_tok, 1), tm_eff)
    if n_pad != n_tok:
        x2d = jnp.pad(x2d, ((0, n_pad - n_tok), (0, 0)))
    n_i = n_pad // tm_eff

    # --- split W1/b1 into value + gate halves, pad hidden/out if needed --------
    w1a = w1c[:, :half]
    w1b = w1c[:, half:]
    b1a = b1[:half].astype(jnp.float32)
    b1b = b1[half:].astype(jnp.float32)
    b2f = b2.astype(jnp.float32)

    if half_p != half:
        pad_h = half_p - half
        # Zero-padded value/gate columns give g = 0 * sigmoid(0) = 0 and the
        # matching zero rows of W2 contribute exactly 0 -> results unchanged.
        w1a = jnp.pad(w1a, ((0, 0), (0, pad_h)))
        w1b = jnp.pad(w1b, ((0, 0), (0, pad_h)))
        b1a = jnp.pad(b1a, (0, pad_h))
        b1b = jnp.pad(b1b, (0, pad_h))
        w2c = jnp.pad(w2c, ((0, pad_h), (0, 0)))
    if out_p != out_f:
        w2c = jnp.pad(w2c, ((0, 0), (0, out_p - out_f)))
        b2f = jnp.pad(b2f, (0, out_p - out_f))

    b1a = b1a.reshape(1, half_p)
    b1b = b1b.reshape(1, half_p)
    b2f = b2f.reshape(1, out_p)

    # --- advisory cost estimate (weights once for Path A, per token tile for B) -
    w_bytes_once = ((2 * in_f * half_p + half_p * out_p) * elt_c
                    + (2 * half_p + out_p) * 4)
    w_passes = 1 if use_resident else n_i
    cost = pl.CostEstimate(
        flops=int(2 * n_pad * (in_f * 2 * half_p + half_p * out_p)),
        transcendentals=int(n_pad * half_p),
        bytes_accessed=int(n_pad * in_f * elt_c + n_pad * out_p * elt_o
                           + w_passes * w_bytes_once),
    )

    if use_resident:
        grid = (n_i,)
        in_specs = [
            pl.BlockSpec((tm_eff, in_f),  lambda i: (i, 0)),   # x tile
            pl.BlockSpec((in_f, half_p),  lambda i: (0, 0)),   # W1 value half (resident)
            pl.BlockSpec((1, half_p),     lambda i: (0, 0)),   # b1 value half
            pl.BlockSpec((in_f, half_p),  lambda i: (0, 0)),   # W1 gate half (resident)
            pl.BlockSpec((1, half_p),     lambda i: (0, 0)),   # b1 gate half
            pl.BlockSpec((half_p, out_p), lambda i: (0, 0)),   # W2 (resident)
            pl.BlockSpec((1, out_p),      lambda i: (0, 0)),   # b2
        ]
        out_specs = pl.BlockSpec((tm_eff, out_p), lambda i: (i, 0))
        scratch = []
        kernel = _glu_mlp_resident_kernel
        dims = ("parallel",)
    else:
        grid = (n_i, n_k)
        in_specs = [
            pl.BlockSpec((tm_eff, in_f), lambda i, k: (i, 0)),  # x tile
            pl.BlockSpec((in_f, th),     lambda i, k: (0, k)),  # W1 value tile
            pl.BlockSpec((1, th),        lambda i, k: (0, k)),  # b1 value tile
            pl.BlockSpec((in_f, th),     lambda i, k: (0, k)),  # W1 gate tile
            pl.BlockSpec((1, th),        lambda i, k: (0, k)),  # b1 gate tile
            pl.BlockSpec((th, out_p),    lambda i, k: (k, 0)),  # W2 tile
            pl.BlockSpec((1, out_p),     lambda i, k: (0, 0)),  # b2
        ]
        out_specs = pl.BlockSpec((tm_eff, out_p), lambda i, k: (i, 0))
        scratch = [pltpu.VMEM((tm_eff, out_p), jnp.float32)]
        kernel = _glu_mlp_tiled_kernel
        dims = ("parallel", "arbitrary")

    out = pl.pallas_call(
        kernel,
        out_shape=jax.ShapeDtypeStruct((n_pad, out_p), out_dtype),
        grid_spec=pltpu.PrefetchScalarGridSpec(
            num_scalar_prefetch=0,
            grid=grid,
            in_specs=in_specs,
            out_specs=out_specs,
            scratch_shapes=scratch,
        ),
        compiler_params=pltpu.CompilerParams(
            dimension_semantics=dims,
            vmem_limit_bytes=int(budget),
        ),
        cost_estimate=cost,
    )(x2d, w1a, b1a, w1b, b1b, w2c, b2f)

    out = out[:n_tok, :out_f]
    return out.reshape(*orig_shape[:-1], out_f)


# ----------------------------------------------------------------------------
# Pure-JAX reference + self-test
# ----------------------------------------------------------------------------
def _ref_glu_mlp(x, w1, b1, w2, b2):
    h = jnp.dot(x, w1) + b1
    half = h.shape[-1] // 2
    g = h[..., :half] * jax.nn.sigmoid(h[..., half:])
    return jnp.dot(g, w2) + b2


if __name__ == "__main__":
    # Small shapes consistent with the module: batch=2, seq=8, in=32,
    # hidden=32 (even, as required), out=32.
    batch, seq = 2, 8
    in_features = 32
    hidden_features = 32
    out_features = 32

    key = jax.random.PRNGKey(0)
    kx, k1, kb1, k2, kb2 = jax.random.split(key, 5)

    x = jax.random.normal(kx, (batch, seq, in_features), dtype=jnp.float32)

    # nn.Linear default init: U(-1/sqrt(fan_in), 1/sqrt(fan_in)).
    bound1 = 1.0 / (in_features ** 0.5)
    w1 = jax.random.uniform(k1, (in_features, hidden_features),
                            minval=-bound1, maxval=bound1, dtype=jnp.float32)
    b1 = jax.random.uniform(kb1, (hidden_features,),
                            minval=-bound1, maxval=bound1, dtype=jnp.float32)

    bound2 = 1.0 / ((hidden_features // 2) ** 0.5)
    w2 = jax.random.uniform(k2, (hidden_features // 2, out_features),
                            minval=-bound2, maxval=bound2, dtype=jnp.float32)
    b2 = jax.random.uniform(kb2, (out_features,),
                            minval=-bound2, maxval=bound2, dtype=jnp.float32)

    y_ref = _ref_glu_mlp(x, w1, b1, w2, b2)

    # Path A: weights VMEM-resident, single (token) grid axis.
    y = jax.block_until_ready(glu_mlp(x, w1, b1, w2, b2))
    assert y.shape == (batch, seq, out_features)
    assert jnp.allclose(y, y_ref, atol=1e-5, rtol=1e-5), "resident path mismatch"

    # Path B: forced hidden-tiled accumulator path (coverage of the fallback).
    y_t = jax.block_until_ready(glu_mlp(x, w1, b1, w2, b2, force_hidden_tiles=True))
    assert jnp.allclose(y_t, y_ref, atol=1e-5, rtol=1e-5), "tiled path mismatch"

    # bf16 MXU-input variant (f32 accumulation); loose tolerance for the cast.
    y_bf = jax.block_until_ready(glu_mlp(x, w1, b1, w2, b2,
                                         compute_dtype=jnp.bfloat16))
    assert jnp.allclose(y_bf, y_ref, atol=1e-1, rtol=1e-1), "bf16 path mismatch"

    print("KERNEL_OK")
</pallas_src>

<mosaic_0001>
module attributes {stable_mosaic.version = 11 : i64} {
  func.func @_glu_mlp_resident_kernel(%arg0: i32, %arg1: memref<8x32xf32, #tpu.memory_space<vmem>>, %arg2: memref<32x16xf32, #tpu.memory_space<vmem>>, %arg3: memref<1x16xf32, #tpu.memory_space<vmem>>, %arg4: memref<32x16xf32, #tpu.memory_space<vmem>>, %arg5: memref<1x16xf32, #tpu.memory_space<vmem>>, %arg6: memref<16x128xf32, #tpu.memory_space<vmem>>, %arg7: memref<1x128xf32, #tpu.memory_space<vmem>>, %arg8: memref<8x128xf32, #tpu.memory_space<vmem>>) attributes {dimension_semantics = [#tpu.dimension_semantics<parallel>], iteration_bounds = array<i64: 2>, scalar_prefetch = 0 : i64, scratch_operands = 0 : i64, tpu.core_type = #tpu.core_type<tc>, window_params = [{transform_indices = @transform_0, window_bounds = array<i64: 8, 32>}, {pipeline_mode = #tpu.pipeline_mode<synchronous>, transform_indices = @transform_1, window_bounds = array<i64: 32, 16>}, {pipeline_mode = #tpu.pipeline_mode<synchronous>, transform_indices = @transform_2, window_bounds = array<i64: 1, 16>}, {pipeline_mode = #tpu.pipeline_mode<synchronous>, transform_indices = @transform_3, window_bounds = array<i64: 32, 16>}, {pipeline_mode = #tpu.pipeline_mode<synchronous>, transform_indices = @transform_4, window_bounds = array<i64: 1, 16>}, {pipeline_mode = #tpu.pipeline_mode<synchronous>, transform_indices = @transform_5, window_bounds = array<i64: 16, 128>}, {pipeline_mode = #tpu.pipeline_mode<synchronous>, transform_indices = @transform_6, window_bounds = array<i64: 1, 128>}, {transform_indices = @transform_7, window_bounds = array<i64: 8, 128>}]} {
    %c0 = arith.constant 0 : index
    %c0_0 = arith.constant 0 : index
    %0 = vector.load %arg1[%c0, %c0_0] : memref<8x32xf32, #tpu.memory_space<vmem>>, vector<8x32xf32>
    %c0_1 = arith.constant 0 : index
    %c0_2 = arith.constant 0 : index
    %1 = vector.load %arg2[%c0_1, %c0_2] : memref<32x16xf32, #tpu.memory_space<vmem>>, vector<32x16xf32>
    %cst = arith.constant dense<0.000000e+00> : vector<8x16xf32>
    %2 = tpu.matmul %0, %1, %cst {dimension_numbers = #tpu.dot_dimension_numbers<[1], [0], [0], [1], [0, 0, 1, 1], [], []>} : vector<8x32xf32>, vector<32x16xf32>, vector<8x16xf32> -> vector<8x16xf32>
    %c0_3 = arith.constant 0 : index
    %c0_4 = arith.constant 0 : index
    %3 = vector.load %arg3[%c0_3, %c0_4] : memref<1x16xf32, #tpu.memory_space<vmem>>, vector<1x16xf32>
    %4 = vector.broadcast %3 : vector<1x16xf32> to vector<8x16xf32>
    %5 = arith.addf %2, %4 : vector<8x16xf32>
    %c0_5 = arith.constant 0 : index
    %c0_6 = arith.constant 0 : index
    %6 = vector.load %arg4[%c0_5, %c0_6] : memref<32x16xf32, #tpu.memory_space<vmem>>, vector<32x16xf32>
    %cst_7 = arith.constant dense<0.000000e+00> : vector<8x16xf32>
    %7 = tpu.matmul %0, %6, %cst_7 {dimension_numbers = #tpu.dot_dimension_numbers<[1], [0], [0], [1], [0, 0, 1, 1], [], []>} : vector<8x32xf32>, vector<32x16xf32>, vector<8x16xf32> -> vector<8x16xf32>
    %c0_8 = arith.constant 0 : index
    %c0_9 = arith.constant 0 : index
    %8 = vector.load %arg5[%c0_8, %c0_9] : memref<1x16xf32, #tpu.memory_space<vmem>>, vector<1x16xf32>
    %9 = vector.broadcast %8 : vector<1x16xf32> to vector<8x16xf32>
    %10 = arith.addf %7, %9 : vector<8x16xf32>
    %11 = arith.negf %10 : vector<8x16xf32>
    %12 = math.exp %11 : vector<8x16xf32>
    %cst_10 = arith.constant 1.000000e+00 : f32
    %13 = vector.broadcast %cst_10 : f32 to vector<8x16xf32>
    %14 = arith.addf %13, %12 : vector<8x16xf32>
    %15 = arith.divf %13, %14 : vector<8x16xf32>
    %16 = arith.mulf %5, %15 : vector<8x16xf32>
    %c0_11 = arith.constant 0 : index
    %c0_12 = arith.constant 0 : index
    %17 = vector.load %arg6[%c0_11, %c0_12] : memref<16x128xf32, #tpu.memory_space<vmem>>, vector<16x128xf32>
    %cst_13 = arith.constant dense<0.000000e+00> : vector<8x128xf32>
    %18 = tpu.matmul %16, %17, %cst_13 {dimension_numbers = #tpu.dot_dimension_numbers<[1], [0], [0], [1], [0, 0, 1, 1], [], []>} : vector<8x16xf32>, vector<16x128xf32>, vector<8x128xf32> -> vector<8x128xf32>
    %c0_14 = arith.constant 0 : index
    %c0_15 = arith.constant 0 : index
    %19 = vector.load %arg7[%c0_14, %c0_15] : memref<1x128xf32, #tpu.memory_space<vmem>>, vector<1x128xf32>
    %20 = vector.broadcast %19 : vector<1x128xf32> to vector<8x128xf32>
    %21 = arith.addf %18, %20 : vector<8x128xf32>
    %c0_16 = arith.constant 0 : index
    %c0_17 = arith.constant 0 : index
    %22 = vector.load %arg8[%c0_16, %c0_17] : memref<8x128xf32, #tpu.memory_space<vmem>>, vector<8x128xf32>
    tpu.vector_store %arg8[%c0_16, %c0_17], %21 {strides = array<i32>} : memref<8x128xf32, #tpu.memory_space<vmem>>, vector<8x128xf32>,
    return
  }
  func.func @transform_0(%arg0: i32) -> (i32, i32) {
    %c0_i32 = arith.constant 0 : i32
    %c0_i32_0 = arith.constant 0 : i32
    return %arg0, %c0_i32 : i32, i32
  }
  func.func @transform_1(%arg0: i32) -> (i32, i32) {
    %c0_i32 = arith.constant 0 : i32
    %c0_i32_0 = arith.constant 0 : i32
    %c0_i32_1 = arith.constant 0 : i32
    return %c0_i32, %c0_i32_0 : i32, i32
  }
  func.func @transform_2(%arg0: i32) -> (i32, i32) {
    %c0_i32 = arith.constant 0 : i32
    %c0_i32_0 = arith.constant 0 : i32
    %c0_i32_1 = arith.constant 0 : i32
    return %c0_i32, %c0_i32_0 : i32, i32
  }
  func.func @transform_3(%arg0: i32) -> (i32, i32) {
    %c0_i32 = arith.constant 0 : i32
    %c0_i32_0 = arith.constant 0 : i32
    %c0_i32_1 = arith.constant 0 : i32
    return %c0_i32, %c0_i32_0 : i32, i32
  }
  func.func @transform_4(%arg0: i32) -> (i32, i32) {
    %c0_i32 = arith.constant 0 : i32
    %c0_i32_0 = arith.constant 0 : i32
    %c0_i32_1 = arith.constant 0 : i32
    return %c0_i32, %c0_i32_0 : i32, i32
  }
  func.func @transform_5(%arg0: i32) -> (i32, i32) {
    %c0_i32 = arith.constant 0 : i32
    %c0_i32_0 = arith.constant 0 : i32
    %c0_i32_1 = arith.constant 0 : i32
    return %c0_i32, %c0_i32_0 : i32, i32
  }
  func.func @transform_6(%arg0: i32) -> (i32, i32) {
    %c0_i32 = arith.constant 0 : i32
    %c0_i32_0 = arith.constant 0 : i32
    %c0_i32_1 = arith.constant 0 : i32
    return %c0_i32, %c0_i32_0 : i32, i32
  }
  func.func @transform_7(%arg0: i32) -> (i32, i32) {
    %c0_i32 = arith.constant 0 : i32
    %c0_i32_0 = arith.constant 0 : i32
    return %arg0, %c0_i32 : i32, i32
  }
}

</mosaic_0001>

<bundles_post_ra>
// kernel: glu_mlp.1
= control target key start
LH: loop header
LB: loop body
LE: loop exit
PB: predicated region body
PF: predicated region fallthrough
CT: control target
= control target key end

     0   :  { %s515_s24 = smov 0   ;;  %s578_s0 = inlined_call_operand.vmem [shape: f32[16,32], index: 0, kind: input, shape index: {}]   ;;  %s579_s1 = inlined_call_operand.vmem [shape: f32[32,16], index: 1, kind: input, shape index: {}]   ;;  %s580_s2 = inlined_call_operand.vmem [shape: f32[1,16], index: 2, kind: input, shape index: {}]   ;;  %s581_s3 = inlined_call_operand.vmem [shape: f32[32,16], index: 3, kind: input, shape index: {}]   ;;  %s582_s4 = inlined_call_operand.vmem [shape: f32[1,16], index: 4, kind: input, shape index: {}]   ;;  %s583_s5 = inlined_call_operand.vmem [shape: f32[16,128], index: 5, kind: input, shape index: {}]   ;;  %s584_s6 = inlined_call_operand.vmem [shape: f32[1,128], index: 6, kind: input, shape index: {}]   ;;  %s585_s7 = inlined_call_operand.vmem [shape: f32[16,128], index: 7, kind: output, shape index: {}]  }
   0x1 LB: > { %s439_s25 = sadd.s32 4294967295, %s473_s24   ;;  %p443_p0 = scmp.ge.s32.totalorder %s473_s24, 1  ;;  %s473_s24 = sphi %s515_s24, %s17_s24  }
   0x2   : > { %p236_p1 = scmp.lt.s32.totalorder %s473_s24, 3 }
   0x4   : > { %p237_p2 = pnand %p443_p0, %p236_p1 }
   0x5   : > { %p266_p3 = scmp.lt.s32.totalorder (!%p237_p2), %s439_s25, 1 }
   0x6   : > { %240 = sbr.rel (%p237_p2) target bundleno = 312 (0x138), region = 48 }
   0xb   : > { %v310_v0 = vld [vmem:[%s581_s3 + $0x18] sm:$0xff]  ;;  %v309_v1 = vld [vmem:[%s581_s3 + $0x10] sm:$0xff]  ;;  %v308_v4 = vld [vmem:[%s581_s3 + $0x8] sm:$0xff]  ;;  %s587_s25 = smov (!%p266_p3, %s439_s25), 1  ;;  %vm283_vm0 = vcmask 261120   ;;  %vm361_vm5 = vcmask 130048  }
   0xc   : > { %327 = vmatpush.msra.mxu1 %v310_v0  ;;  %v278_v2 = vld [vmem:[%s579_s1 + $0x18] sm:$0xff]  ;;  %v277_v3 = vld [vmem:[%s579_s1 + $0x10] sm:$0xff]  ;;  %v276_v5 = vld [vmem:[%s579_s1 + $0x8] sm:$0xff]  ;;  %s444_s17 = sshll.u32 %s587_s25, 3 }
   0xd   : > { %299 = vmatpush.msra.mxu0 %v278_v2  ;;  %v307_v6 = vld [vmem:[%s581_s3] sm:$0xff]  ;;  %s269_s20 = scalar_lea.vmem %s578_s0, %s444_s17  ;;  %v356_v10 = vld [vmem:[%s583_s5 + $0x8] sm:$0xff]  ;;  %s273_s14 = scalar_lea.vmem %s585_s7, %s444_s17 }
   0xe   : > { %328 = vmatpush.msra.mxu1 %v309_v1  ;;  %v275_v7 = vld [vmem:[%s579_s1] sm:$0xff]  ;;  %379 = vmatpush.msra.mxu2 %v356_v10 }
   0xf   : > { %300 = vmatpush.msra.mxu0 %v277_v3  ;;  %v274_v8 = vld [vmem:[%s269_s20] sm:$0xff] }
  0x10   : > { %329 = vmatpush.msra.mxu1 %v308_v4  ;;  %v460_v9 = vld [vmem:[%s582_s4] ss:$0 sm:$0xff] }
  0x11   : > { %301 = vmatpush.msra.mxu0 %v276_v5  ;;  %v355_v11 = vld [vmem:[%s583_s5] sm:$0xff] }
  0x12   : > { %330 = vmatpush.msra.mxu1 %v307_v6  ;;  %380 = vmatpush.msra.mxu2 %v355_v11  ;;  %v461_v19 = vld [vmem:[%s580_s2] ss:$0 sm:$0xff] }
  0x13   : > { %447 = vmatmul.msk.f32.vlgmr.msra.gmra.mxu1 %vm283_vm0, %v274_v8  ;;  %302 = vmatpush.msra.mxu0 %v275_v7  ;;  %v462_v31 = vld [vmem:[%s584_s6] ss:$0 sm:$0xff] }
  0x14   : > { %446 = vmatmul.msk.f32.vlgmr.msra.gmra.mxu0 %vm283_vm0, %v274_v8 }
  0x90   : > { %v332_v12 = vpop.f32.mrf.mxu1 }
  0x91   : > { %v333_v13 = vadd.f32 %v460_v9, %v332_v12  ;;  %v304_v21 = vpop.f32.mrf.mxu0 }
  0x92   : > { %v305_v25 = vadd.f32 %v461_v19, %v304_v21 }
  0x93   : > { %v448_v14 = vmul.f32 -1.442695, %v333_v13 }
  0x95   : > { %463 = vpow2.f32 %v448_v14 }
  0x9b   : > { %v464_v15 = vpop.eup %463 }
  0x9c   : > { %v338_v16 = vadd.f32 1.0, %v464_v15 }
  0x9e   : > { %465 = vrcp.f32 %v338_v16  ;;  %v350_v22 = vand.u32 2147483648, %v338_v16  ;;  %v348_v24 = vand.u32 2147483647, %v338_v16  ;;  %vm344_vm2 = vweird.f32 %v338_v16 }
  0xa0   : > { %v351_v27 = vor.u32 1.1754944e-38, %v350_v22  ;;  %vm349_vm4 = vcmp.eq.f32.partialorder %v348_v24, 8.507059e+37 }
  0xa4   : > { %v466_v17 = vpop.eup %465 }
  0xa5   : > { %v340_v18 = vmul.f32 %v466_v17, %v338_v16  ;;  %vm345_vm1 = vweird.f32 %v466_v17 }
  0xa6   : > { %vm346_vm3 = vmor %vm344_vm2, %vm345_vm1 }
  0xa7   : > { %v341_v20 = vsub.f32 1.0, %v340_v18 }
  0xa9   : > { %v342_v23 = vmul.f32 %v466_v17, %v341_v20 }
  0xab   : > { %v343_v26 = vadd.f32 %v466_v17, %v342_v23 }
  0xad   : > { %v347_v28 = vsel %vm346_vm3, %v466_v17, %v343_v26 }
  0xae   : > { %v352_v29 = vsel %vm349_vm4, %v351_v27, %v347_v28 }
  0xaf   : > { %v354_v30 = vmul.f32 %v352_v29, %v305_v25 }
  0xb1   : > { %449 = vmatmul.msk.f32.vlgmr.msra.gmra.mxu2 %vm361_vm5, %v354_v30 }
 0x134   : > { %v382_v32 = vpop.f32.mrf.mxu2 }
 0x135   : > { %v383_v33 = vadd.f32 %v462_v31, %v382_v32 }
 0x137   : > { %385 = vst [vmem:[%s273_s14] sm:$0xff] %v383_v33 }
 0x138 PF: > { %s17_s24 = sadd.s32 1, %s473_s24  }
 0x139   : > { %p14_p4 = scmp.ge.s32.totalorder %s17_s24, 4  }
 0x13b   :  { %16 = sbr.rel (!%p14_p4) target bundleno = 1 (0x1), region = 78 }

</bundles_post_ra>
